<compile_context>
chip_gen: v7x
topology: tpu7x:2x2x1
jax: 0.10.0
libtpu: 0.0.40
codegen_flags: <defaults>
</compile_context>

<pallas_src>
import functools

import jax
import jax.numpy as jnp
from jax.experimental import pallas as pl
from jax.experimental.pallas import tpu as pltpu


def _delta_kernel(x_ref, o_ref, *, neg_len, scale):
    # x_ref: (TB, seqL, TD)   o_ref: (TB, TD)
    x = x_ref[...].astype(jnp.float32)
    seq_idx = jax.lax.broadcasted_iota(jnp.int32, (1, x.shape[1], 1), 1)
    # +/- 2/seqL, constant-folded at compile time (no ref slicing needed).
    w = jnp.where(seq_idx < neg_len, -scale, scale)
    o_ref[...] = jnp.sum(x * w, axis=1).astype(o_ref.dtype)


def _pick_tiles(B, seqL, inDims, itemsize, target_bytes=4 << 20):
    """Choose (batch_tile, feature_tile) so one (TB, seqL, TD) tile is about
    target_bytes of VMEM, accounting for (8, 128) sublane/lane padding."""
    item = max(int(itemsize), 4)  # f32 accumulation temp dominates for bf16
    sublane = ((seqL + 7) // 8) * 8
    lane_full = ((inDims + 127) // 128) * 128

    if sublane * lane_full * item <= target_bytes:
        td = inDims                      # full feature extent fits one row
        lane = lane_full
    else:                                # huge seqL*inDims: tile features too
        td = max(128, (target_bytes // (sublane * item)) // 128 * 128)
        td = min(td, lane_full)
        lane = td

    per_row = sublane * lane * item
    tb = max(1, target_bytes // per_row)
    if tb >= B:
        tb = B                           # block == full batch dim (always legal)
    else:
        tb = max(8, (tb // 8) * 8)       # keep output block sublane-aligned
    return int(tb), int(td)


def delta_forward(x, batch_tile=None, feature_tile=None):
    """x: [B, seqL, inDims] -> [B, inDims].  Weight (+/- 2/seqL) is baked in."""
    B, seqL, inDims = x.shape
    neg_len = seqL // 2
    scale = 2.0 / float(seqL)            # == 1.0 / (seqL / 2.0), as in PyTorch

    auto_tb, auto_td = _pick_tiles(B, seqL, inDims, x.dtype.itemsize)
    TB = batch_tile if batch_tile is not None else auto_tb
    TD = feature_tile if feature_tile is not None else auto_td
    grid = (pl.cdiv(B, TB), pl.cdiv(inDims, TD))   # overhanging blocks are masked

    kernel = functools.partial(_delta_kernel, neg_len=neg_len, scale=scale)

    # TODO(synk): for real deployments keep inDims a multiple of 128 so the
    # output stores are fully lane-dense (unmasked vst); output traffic is
    # only 1/seqL of the input, so the masked-store cost here is minor.
    return pl.pallas_call(
        kernel,
        out_shape=jax.ShapeDtypeStruct((B, inDims), x.dtype),
        grid_spec=pltpu.PrefetchScalarGridSpec(
            num_scalar_prefetch=0,
            grid=grid,
            in_specs=[
                pl.BlockSpec((TB, seqL, TD), lambda i, j: (i, 0, j)),
            ],
            out_specs=pl.BlockSpec((TB, TD), lambda i, j: (i, j)),
        ),
        compiler_params=pltpu.CompilerParams(
            dimension_semantics=("parallel", "parallel"),  # megacore-shardable
        ),
    )(x)


def make_delta_weight(seqL):
    # Reference weight (matches the PyTorch module); only used for checking.
    w = jnp.ones((seqL,), jnp.float32) / (seqL / 2.0)
    w = w.at[: seqL // 2].multiply(-1.0)
    return w


if __name__ == "__main__":
    key = jax.random.PRNGKey(0)

    # Primary small test: matches the module's typical usage.
    B, seqL, inDims = 2, 8, 32
    x = jax.random.normal(key, (B, seqL, inDims), dtype=jnp.float32)
    out = jax.block_until_ready(delta_forward(x))
    ref = jnp.einsum("bsd,s->bd", x, make_delta_weight(seqL))
    assert out.shape == (B, inDims)
    assert jnp.allclose(out, ref, atol=1e-5, rtol=1e-5)

    # Secondary test: odd seqL + batch not divisible by the tile
    # (multiple grid steps along batch, masked writes on the last block).
    B2, seqL2, inDims2 = 37, 5, 32
    x2 = jax.random.normal(jax.random.PRNGKey(1), (B2, seqL2, inDims2),
                           dtype=jnp.float32)
    out2 = jax.block_until_ready(delta_forward(x2, batch_tile=8))
    ref2 = jnp.einsum("bsd,s->bd", x2, make_delta_weight(seqL2))
    assert out2.shape == (B2, inDims2)
    assert jnp.allclose(out2, ref2, atol=1e-5, rtol=1e-5)

    # Third test: exercise the feature-tiled grid axis.
    B3, seqL3, inDims3 = 4, 6, 256
    x3 = jax.random.normal(jax.random.PRNGKey(2), (B3, seqL3, inDims3),
                           dtype=jnp.float32)
    out3 = jax.block_until_ready(delta_forward(x3, feature_tile=128))
    ref3 = jnp.einsum("bsd,s->bd", x3, make_delta_weight(seqL3))
    assert out3.shape == (B3, inDims3)
    assert jnp.allclose(out3, ref3, atol=1e-5, rtol=1e-5)

    print("KERNEL_OK")
</pallas_src>

<mosaic_0001>
module attributes {stable_mosaic.version = 11 : i64} {
  func.func @_delta_kernel(%arg0: i32, %arg1: i32, %arg2: memref<2x8x32xf32, #tpu.memory_space<vmem>>, %arg3: memref<2x32xf32, #tpu.memory_space<vmem>>) attributes {dimension_semantics = [#tpu.dimension_semantics<parallel>, #tpu.dimension_semantics<parallel>], iteration_bounds = array<i64: 1, 1>, scalar_prefetch = 0 : i64, scratch_operands = 0 : i64, tpu.core_type = #tpu.core_type<tc>, window_params = [{transform_indices = @transform_0, window_bounds = array<i64: 2, 8, 32>}, {transform_indices = @transform_1, window_bounds = array<i64: 2, 32>}]} {
    %c0 = arith.constant 0 : index
    %c0_0 = arith.constant 0 : index
    %c0_1 = arith.constant 0 : index
    %0 = vector.load %arg2[%c0, %c0_0, %c0_1] : memref<2x8x32xf32, #tpu.memory_space<vmem>>, vector<2x8x32xf32>
    %1 = tpu.iota {dimensions = array<i32: 1>} : vector<1x8x1xi32>
    %c4_i32 = arith.constant 4 : i32
    %2 = vector.broadcast %c4_i32 : i32 to vector<1x8x1xi32>
    %3 = arith.cmpi slt, %1, %2 : vector<1x8x1xi32>
    %cst = arith.constant -2.500000e-01 : f32
    %cst_2 = arith.constant 2.500000e-01 : f32
    %4 = vector.broadcast %cst : f32 to vector<1x8x1xf32>
    %5 = vector.broadcast %cst_2 : f32 to vector<1x8x1xf32>
    %6 = arith.select %3, %4, %5 : vector<1x8x1xi1>, vector<1x8x1xf32>
    %7 = vector.broadcast %6 : vector<1x8x1xf32> to vector<2x8x32xf32>
    %8 = arith.mulf %0, %7 : vector<2x8x32xf32>
    %cst_3 = arith.constant dense<0.000000e+00> : vector<2x32xf32>
    %9 = vector.multi_reduction <add>, %8, %cst_3 [1] : vector<2x8x32xf32> to vector<2x32xf32>
    %c0_4 = arith.constant 0 : index
    %c0_5 = arith.constant 0 : index
    %10 = vector.load %arg3[%c0_4, %c0_5] : memref<2x32xf32, #tpu.memory_space<vmem>>, vector<2x32xf32>
    tpu.vector_store %arg3[%c0_4, %c0_5], %9 {strides = array<i32>} : memref<2x32xf32, #tpu.memory_space<vmem>>, vector<2x32xf32>,
    return
  }
  func.func @transform_0(%arg0: i32, %arg1: i32) -> (i32, i32, i32) {
    %c0_i32 = arith.constant 0 : i32
    %c0_i32_0 = arith.constant 0 : i32
    return %arg0, %c0_i32, %arg1 : i32, i32, i32
  }
  func.func @transform_1(%arg0: i32, %arg1: i32) -> (i32, i32) {
    %c0_i32 = arith.constant 0 : i32
    return %arg0, %arg1 : i32, i32
  }
}

</mosaic_0001>

<bundles_post_ra>
// kernel: tpu_custom_call.1
= control target key start
LH: loop header
LB: loop body
LE: loop exit
PB: predicated region body
PF: predicated region fallthrough
CT: control target
= control target key end

     0   :  { %6 = vsyncpa [#allocation3], 0  ;;  %s160_s0 = inlined_call_operand.hbm [shape: f32[2,8,32], index: 0, kind: input, shape index: {}]   ;;  %s161_s1 = inlined_call_operand.hbm [shape: f32[2,32], index: 1, kind: output, shape index: {}]  }
   0x1   :  { %7 = vsyncpa [#allocation4], 0  ;;  %s121_s6 = smov [#allocation2]   ;;  %s73_s10 = scalar_lea.hbm %s160_s0, 256 }
   0x2   :  { %s13_s7 = sshll.u32 %s121_s6, 4  ;;  %p74_p0 = scmp.ne.s32.totalorder %s160_s0, %s73_s10  ;;  %s14_s7 = int_to_ptr.vmem [resolvable:$true] %s13_s7 }
   0x3   :  { %p77_p1 = scmp.lt.u32.totalorder %s73_s10, %s160_s0 }
   0x5   :  { %p79_p2 = pnand %p77_p1, %p74_p0 }
   0x7   :  { %82 = shalt.err (!%p79_p2)
}
   0x8   :  { %s83_s15 = scalar_lea.vmem %s14_s7, 256  ;;  %p88_p4 = scmp.lt.s32.totalorder %s14_s7, %s14_s7 }
   0x9   :  { %p84_p3 = scmp.ne.s32.totalorder %s14_s7, %s83_s15  ;;  %p89_p5 = scmp.lt.s32.totalorder %s83_s15, %s83_s15 }
   0xb   :  { %p90_p6 = por %p89_p5, %p88_p4 }
   0xd   :  { %p91_p7 = pnand %p90_p6, %p84_p3 }
   0xf   :  { %94 = shalt.err (!%p91_p7)
}
  0x10   :  { %s122_s16 = smov 128   ;;  %s123_s17 = smov 8  }
  0x11   :  { %19 = dma.hbm_to_vmem [thread:$0]  %s160_s0, 256, %s14_s7, [#allocation3], %s122_s16, %s122_s16, %s123_s17  }
  0x12   :  { %117 = dma.done.wait [#allocation3], 256  }
  0x13   :  { %118 = vsyncadd [#allocation3], 4294967040  ;;  %v25_v0 = vlaneseq  ;;  %v124_v2 = vmov 0.25   ;;  %v23_v4 = vld [vmem:[#allocation2] sm:$0xff]  ;;  %v24_v5 = vld [vmem:[#allocation2 + $0x8] sm:$0xff]  ;;  %vm31_vm1 = vcmask 261120  }
  0x14   :  { %s125_s0 = smov [#allocation5]   ;;  %vm48_vm2 = vcmask 1041409   ;;  %vm51_vm3 = vcmask 254976  }
  0x15   :  { %v26_v1 = vshrl.u32 %v25_v0, 7  ;;  %s59_s20 = sshll.u32 %s125_s0, 4  ;;  %s60_s20 = int_to_ptr.vmem [resolvable:$true] %s59_s20 }
  0x16   :  { %s95_s21 = scalar_lea.vmem %s60_s20, 32  ;;  %p100_p9 = scmp.lt.s32.totalorder %s60_s20, %s60_s20 }
  0x17   :  { %vm27_vm0 = vcmp.lt.s32.totalorder %v26_v1, 4  ;;  %p96_p8 = scmp.ne.s32.totalorder %s60_s20, %s95_s21  ;;  %p101_p10 = scmp.lt.s32.totalorder %s95_s21, %s95_s21 }
  0x18   :  { %v28_v3 = vsel %vm27_vm0, -0.25, %v124_v2 }
  0x19   :  { %v29_v6 = vmul.f32 %v28_v3, %v23_v4  ;;  %v30_v7 = vmul.f32 %v28_v3, %v24_v5  ;;  %p102_p11 = por %p101_p10, %p100_p9 }
  0x1b   :  { %v32_v8 = vsel %vm31_vm1, %v29_v6, 0.0  ;;  %v39_v9 = vsel %vm31_vm1, %v30_v7, 0.0  ;;  %p103_p12 = pnand %p102_p11, %p96_p8 }
  0x1c   :  { %v33_v10 = vrot.slane %v32_v8, 4  ;;  %v40_v11 = vrot.slane %v39_v9, 4 }
  0x1e   :  { %v34_v12 = vadd.f32 %v33_v10, %v32_v8  ;;  %v41_v13 = vadd.f32 %v40_v11, %v39_v9 }
  0x20   :  { %v35_v14 = vrot.slane %v34_v12, 2  ;;  %v42_v15 = vrot.slane %v41_v13, 2 }
  0x22   :  { %v36_v16 = vadd.f32 %v35_v14, %v34_v12  ;;  %v43_v17 = vadd.f32 %v42_v15, %v41_v13 }
  0x24   :  { %v37_v18 = vrot.slane %v36_v16, 1  ;;  %v44_v19 = vrot.slane %v43_v17, 1 }
  0x26   :  { %v38_v20 = vadd.f32 %v37_v18, %v36_v16  ;;  %v45_v21 = vadd.f32 %v44_v19, %v43_v17 }
  0x28   :  { %v49_v22 = vsel %vm48_vm2, %v45_v21, %v38_v20 }
  0x29   :  { %52 = vst.msk [vmem:[#allocation5] sm:$0x3] %vm51_vm3, %v49_v22 }
  0x2a   :  { %106 = shalt.err (!%p103_p12)
}
  0x2b   :  { %s107_s24 = scalar_lea.hbm %s161_s1, 32 }
  0x2c   :  { %p108_p13 = scmp.ne.s32.totalorder %s161_s1, %s107_s24  ;;  %p111_p0 = scmp.lt.u32.totalorder %s107_s24, %s161_s1 }
  0x2e   :  { %p113_p1 = pnand %p111_p0, %p108_p13 }
  0x30   :  { %116 = shalt.err (!%p113_p1)
}
  0x31   :  { %62 = dma.vmem_to_hbm [thread:$0]  %s60_s20, 32, %s161_s1, [#allocation4]  }
  0x32   :  { %119 = dma.done.wait [#allocation4], 32  }
  0x33   :  { %120 = vsyncadd [#allocation4], 4294967264 }
  0x34   :  { %66 = vsyncpa [#allocation3], 1 }
  0x35   :  { %67 = vsyncpa [#allocation4], 1 }

</bundles_post_ra>
